<compile_context>
chip_gen: v7x
topology: tpu7x:2x2x1
jax: 0.10.0
libtpu: 0.0.40
codegen_flags: <defaults>
</compile_context>

<pallas_src>
import numpy as np
import jax
import jax.numpy as jnp
from jax.experimental import pallas as pl
from jax.experimental.pallas import tpu as pltpu


def _cylinder_sdf_kernel(rotmat_ref, bias_ref, size_ref, pts_ref, out_ref):
    # pts_ref: (3, TR, 128) VMEM tile; rotmat/bias/size are tiny SMEM arrays.
    # Hoist all scalar reads once.
    r00 = rotmat_ref[0]; r01 = rotmat_ref[1]; r02 = rotmat_ref[2]
    r10 = rotmat_ref[3]; r11 = rotmat_ref[4]; r12 = rotmat_ref[5]
    r20 = rotmat_ref[6]; r21 = rotmat_ref[7]; r22 = rotmat_ref[8]
    b0 = bias_ref[0]; b1 = bias_ref[1]; b2 = bias_ref[2]
    s0 = size_ref[0]; s1 = size_ref[1]

    x = pts_ref[0]                                   # (TR, 128)
    y = pts_ref[1]
    z = pts_ref[2]

    # point_local = p @ R + b, with b = -center @ R precomputed in the wrapper.
    lx = x * r00 + y * r10 + z * r20 + b0
    ly = x * r01 + y * r11 + z * r21 + b1
    lz = x * r02 + y * r12 + z * r22 + b2

    # radial distance in the xz-plane (abs is a no-op on a norm)
    radial = jnp.sqrt(lx * lx + lz * lz)

    d0 = radial - s0
    d1 = jnp.abs(ly) - s1

    inside = jnp.minimum(jnp.maximum(d0, d1), 0.0)
    outside = jnp.sqrt(jnp.maximum(d0, 0.0) ** 2 + jnp.maximum(d1, 0.0) ** 2)

    out_ref[...] = inside + outside                  # (TR, 128), unmasked store


def cylinder_sdf(points, center, rotmat, size, *, tr=1024):
    """points: (..., 3). Returns signed distance of shape (N, 1), N = prod(leading dims).

    tr = tile rows (multiple of 8); each grid step processes tr*128 points.
    """
    pts = points.reshape(-1, 3).astype(jnp.float32)          # (N, 3)
    n = pts.shape[0]

    # Row/lane blocking: point p -> (row = p // 128, lane = p % 128).
    n_rows = -(-n // 128)                                    # ceil(n / 128)
    tr_eff = max(8, min(tr, ((n_rows + 7) // 8) * 8))        # multiple of 8
    n_rows_pad = ((n_rows + tr_eff - 1) // tr_eff) * tr_eff
    n_pad = n_rows_pad * 128

    pts_pad = jnp.pad(pts, ((0, n_pad - n), (0, 0)))         # (n_pad, 3)
    pts_soa = pts_pad.T.reshape(3, n_rows_pad, 128)          # planar / lane-dense

    center_f = center.reshape(1, 3).astype(jnp.float32)
    rotmat_f = rotmat.reshape(3, 3).astype(jnp.float32)
    size_f = size.reshape(-1).astype(jnp.float32)            # (2,)
    bias = -(center_f @ rotmat_f).reshape(-1)                # (3,)  = -c @ R
    rot_flat = rotmat_f.reshape(-1)                          # (9,)  row-major

    out = pl.pallas_call(
        _cylinder_sdf_kernel,
        out_shape=jax.ShapeDtypeStruct((n_rows_pad, 128), jnp.float32),
        grid_spec=pltpu.PrefetchScalarGridSpec(
            num_scalar_prefetch=0,
            grid=(n_rows_pad // tr_eff,),
            in_specs=[
                pl.BlockSpec(memory_space=pltpu.MemorySpace.SMEM),     # rotmat (9,)
                pl.BlockSpec(memory_space=pltpu.MemorySpace.SMEM),     # bias   (3,)
                pl.BlockSpec(memory_space=pltpu.MemorySpace.SMEM),     # size   (2,)
                pl.BlockSpec((3, tr_eff, 128), lambda i: (0, i, 0)),   # points tile
            ],
            out_specs=pl.BlockSpec((tr_eff, 128), lambda i: (i, 0)),
        ),
        compiler_params=pltpu.CompilerParams(
            dimension_semantics=("parallel",)),                        # megacore / 2-TC sharding
    )(rot_flat, bias, size_f, pts_soa)

    return out.reshape(-1)[:n].reshape(-1, 1)                # (N, 1)


def _reference(points, center, rotmat, size):
    """Pure-JAX reference mirroring the PyTorch forward (float32)."""
    p = points.reshape(-1, 3).astype(jnp.float32)
    local = (p - center.reshape(1, 3)) @ rotmat.reshape(3, 3)
    radial = jnp.linalg.norm(local[:, [0, 2]], axis=1)[:, None]
    diff = jnp.abs(jnp.concatenate([radial, local[:, 1:2]], axis=1)) - size.reshape(1, 2)
    sd = (jnp.minimum(jnp.maximum(diff[:, 0], diff[:, 1]), 0.0)
          + jnp.linalg.norm(jnp.maximum(diff, 0.0), axis=-1))
    return sd[:, None]


if __name__ == "__main__":
    key = jax.random.PRNGKey(0)

    # Module __init__ defaults plus a nontrivial center so the bias path is exercised.
    center = jnp.array([0.05, -0.1, 0.02], dtype=jnp.float32)
    rotmat = jnp.eye(3, dtype=jnp.float32)
    size = jnp.array([0.03, 0.35], dtype=jnp.float32)

    # Small example input: batch=2, seq=8 points in 3D -> flattened to N=16.
    points = jax.random.normal(key, (2, 8, 3), dtype=jnp.float32)

    out = cylinder_sdf(points, center, rotmat, size)
    out = jax.block_until_ready(out)
    ref = _reference(points, center, rotmat, size)
    np.testing.assert_allclose(np.asarray(out), np.asarray(ref), rtol=1e-5, atol=1e-5)

    # Second check exercising multiple grid steps and a ragged tail.
    key2 = jax.random.PRNGKey(1)
    points2 = jax.random.normal(key2, (2065, 3), dtype=jnp.float32)
    out2 = cylinder_sdf(points2, center, rotmat, size, tr=8)
    out2 = jax.block_until_ready(out2)
    ref2 = _reference(points2, center, rotmat, size)
    np.testing.assert_allclose(np.asarray(out2), np.asarray(ref2), rtol=1e-5, atol=1e-5)

    print("KERNEL_OK")
</pallas_src>

<mosaic_0001>
module attributes {stable_mosaic.version = 11 : i64} {
  func.func @_cylinder_sdf_kernel(%arg0: i32, %arg1: memref<9xf32, #tpu.memory_space<smem>>, %arg2: memref<3xf32, #tpu.memory_space<smem>>, %arg3: memref<2xf32, #tpu.memory_space<smem>>, %arg4: memref<3x8x128xf32, #tpu.memory_space<vmem>>, %arg5: memref<8x128xf32, #tpu.memory_space<vmem>>) attributes {dimension_semantics = [#tpu.dimension_semantics<parallel>], iteration_bounds = array<i64: 1>, scalar_prefetch = 0 : i64, scratch_operands = 0 : i64, tpu.core_type = #tpu.core_type<tc>, window_params = [{transform_indices = @transform_0, window_bounds = array<i64: 9>}, {transform_indices = @transform_1, window_bounds = array<i64: 3>}, {transform_indices = @transform_2, window_bounds = array<i64: 2>}, {transform_indices = @transform_3, window_bounds = array<i64: 3, 8, 128>}, {transform_indices = @transform_4, window_bounds = array<i64: 8, 128>}]} {
    %c0 = arith.constant 0 : index
    %0 = memref.load %arg1[%c0] : memref<9xf32, #tpu.memory_space<smem>>
    %c1 = arith.constant 1 : index
    %1 = memref.load %arg1[%c1] : memref<9xf32, #tpu.memory_space<smem>>
    %c2 = arith.constant 2 : index
    %2 = memref.load %arg1[%c2] : memref<9xf32, #tpu.memory_space<smem>>
    %c3 = arith.constant 3 : index
    %3 = memref.load %arg1[%c3] : memref<9xf32, #tpu.memory_space<smem>>
    %c4 = arith.constant 4 : index
    %4 = memref.load %arg1[%c4] : memref<9xf32, #tpu.memory_space<smem>>
    %c5 = arith.constant 5 : index
    %5 = memref.load %arg1[%c5] : memref<9xf32, #tpu.memory_space<smem>>
    %c6 = arith.constant 6 : index
    %6 = memref.load %arg1[%c6] : memref<9xf32, #tpu.memory_space<smem>>
    %c7 = arith.constant 7 : index
    %7 = memref.load %arg1[%c7] : memref<9xf32, #tpu.memory_space<smem>>
    %c8 = arith.constant 8 : index
    %8 = memref.load %arg1[%c8] : memref<9xf32, #tpu.memory_space<smem>>
    %c0_0 = arith.constant 0 : index
    %9 = memref.load %arg2[%c0_0] : memref<3xf32, #tpu.memory_space<smem>>
    %c1_1 = arith.constant 1 : index
    %10 = memref.load %arg2[%c1_1] : memref<3xf32, #tpu.memory_space<smem>>
    %c2_2 = arith.constant 2 : index
    %11 = memref.load %arg2[%c2_2] : memref<3xf32, #tpu.memory_space<smem>>
    %c0_3 = arith.constant 0 : index
    %12 = memref.load %arg3[%c0_3] : memref<2xf32, #tpu.memory_space<smem>>
    %c1_4 = arith.constant 1 : index
    %13 = memref.load %arg3[%c1_4] : memref<2xf32, #tpu.memory_space<smem>>
    %c0_5 = arith.constant 0 : index
    %c0_6 = arith.constant 0 : index
    %c0_7 = arith.constant 0 : index
    %14 = vector.load %arg4[%c0_5, %c0_6, %c0_7] : memref<3x8x128xf32, #tpu.memory_space<vmem>>, vector<1x8x128xf32>
    %15 = vector.shape_cast %14 : vector<1x8x128xf32> to vector<8x128xf32>
    %c1_8 = arith.constant 1 : index
    %c0_9 = arith.constant 0 : index
    %c0_10 = arith.constant 0 : index
    %16 = vector.load %arg4[%c1_8, %c0_9, %c0_10] : memref<3x8x128xf32, #tpu.memory_space<vmem>>, vector<1x8x128xf32>
    %17 = vector.shape_cast %16 : vector<1x8x128xf32> to vector<8x128xf32>
    %c2_11 = arith.constant 2 : index
    %c0_12 = arith.constant 0 : index
    %c0_13 = arith.constant 0 : index
    %18 = vector.load %arg4[%c2_11, %c0_12, %c0_13] : memref<3x8x128xf32, #tpu.memory_space<vmem>>, vector<1x8x128xf32>
    %19 = vector.shape_cast %18 : vector<1x8x128xf32> to vector<8x128xf32>
    %20 = vector.broadcast %0 : f32 to vector<8x128xf32>
    %21 = arith.mulf %15, %20 : vector<8x128xf32>
    %22 = vector.broadcast %3 : f32 to vector<8x128xf32>
    %23 = arith.mulf %17, %22 : vector<8x128xf32>
    %24 = arith.addf %21, %23 : vector<8x128xf32>
    %25 = vector.broadcast %6 : f32 to vector<8x128xf32>
    %26 = arith.mulf %19, %25 : vector<8x128xf32>
    %27 = arith.addf %24, %26 : vector<8x128xf32>
    %28 = vector.broadcast %9 : f32 to vector<8x128xf32>
    %29 = arith.addf %27, %28 : vector<8x128xf32>
    %30 = vector.broadcast %1 : f32 to vector<8x128xf32>
    %31 = arith.mulf %15, %30 : vector<8x128xf32>
    %32 = vector.broadcast %4 : f32 to vector<8x128xf32>
    %33 = arith.mulf %17, %32 : vector<8x128xf32>
    %34 = arith.addf %31, %33 : vector<8x128xf32>
    %35 = vector.broadcast %7 : f32 to vector<8x128xf32>
    %36 = arith.mulf %19, %35 : vector<8x128xf32>
    %37 = arith.addf %34, %36 : vector<8x128xf32>
    %38 = vector.broadcast %10 : f32 to vector<8x128xf32>
    %39 = arith.addf %37, %38 : vector<8x128xf32>
    %40 = vector.broadcast %2 : f32 to vector<8x128xf32>
    %41 = arith.mulf %15, %40 : vector<8x128xf32>
    %42 = vector.broadcast %5 : f32 to vector<8x128xf32>
    %43 = arith.mulf %17, %42 : vector<8x128xf32>
    %44 = arith.addf %41, %43 : vector<8x128xf32>
    %45 = vector.broadcast %8 : f32 to vector<8x128xf32>
    %46 = arith.mulf %19, %45 : vector<8x128xf32>
    %47 = arith.addf %44, %46 : vector<8x128xf32>
    %48 = vector.broadcast %11 : f32 to vector<8x128xf32>
    %49 = arith.addf %47, %48 : vector<8x128xf32>
    %50 = arith.mulf %29, %29 : vector<8x128xf32>
    %51 = arith.mulf %49, %49 : vector<8x128xf32>
    %52 = arith.addf %50, %51 : vector<8x128xf32>
    %53 = math.sqrt %52 : vector<8x128xf32>
    %54 = vector.broadcast %12 : f32 to vector<8x128xf32>
    %55 = arith.subf %53, %54 : vector<8x128xf32>
    %56 = math.absf %39 : vector<8x128xf32>
    %57 = vector.broadcast %13 : f32 to vector<8x128xf32>
    %58 = arith.subf %56, %57 : vector<8x128xf32>
    %59 = arith.maximumf %55, %58 : vector<8x128xf32>
    %cst = arith.constant 0.000000e+00 : f32
    %60 = vector.broadcast %cst : f32 to vector<8x128xf32>
    %61 = arith.minimumf %59, %60 : vector<8x128xf32>
    %cst_14 = arith.constant 0.000000e+00 : f32
    %62 = vector.broadcast %cst_14 : f32 to vector<8x128xf32>
    %63 = arith.maximumf %55, %62 : vector<8x128xf32>
    %64 = arith.mulf %63, %63 : vector<8x128xf32>
    %cst_15 = arith.constant 0.000000e+00 : f32
    %65 = vector.broadcast %cst_15 : f32 to vector<8x128xf32>
    %66 = arith.maximumf %58, %65 : vector<8x128xf32>
    %67 = arith.mulf %66, %66 : vector<8x128xf32>
    %68 = arith.addf %64, %67 : vector<8x128xf32>
    %69 = math.sqrt %68 : vector<8x128xf32>
    %70 = arith.addf %61, %69 : vector<8x128xf32>
    %c0_16 = arith.constant 0 : index
    %c0_17 = arith.constant 0 : index
    %71 = vector.load %arg5[%c0_16, %c0_17] : memref<8x128xf32, #tpu.memory_space<vmem>>, vector<8x128xf32>
    tpu.vector_store %arg5[%c0_16, %c0_17], %70 {strides = array<i32>} : memref<8x128xf32, #tpu.memory_space<vmem>>, vector<8x128xf32>,
    return
  }
  func.func @transform_0(%arg0: i32) -> i32 {
    %c0_i32 = arith.constant 0 : i32
    %c0_i32_0 = arith.constant 0 : i32
    return %c0_i32 : i32
  }
  func.func @transform_1(%arg0: i32) -> i32 {
    %c0_i32 = arith.constant 0 : i32
    %c0_i32_0 = arith.constant 0 : i32
    return %c0_i32 : i32
  }
  func.func @transform_2(%arg0: i32) -> i32 {
    %c0_i32 = arith.constant 0 : i32
    %c0_i32_0 = arith.constant 0 : i32
    return %c0_i32 : i32
  }
  func.func @transform_3(%arg0: i32) -> (i32, i32, i32) {
    %c0_i32 = arith.constant 0 : i32
    %c0_i32_0 = arith.constant 0 : i32
    %c0_i32_1 = arith.constant 0 : i32
    return %c0_i32, %arg0, %c0_i32_0 : i32, i32, i32
  }
  func.func @transform_4(%arg0: i32) -> (i32, i32) {
    %c0_i32 = arith.constant 0 : i32
    %c0_i32_0 = arith.constant 0 : i32
    return %arg0, %c0_i32 : i32, i32
  }
}

</mosaic_0001>

<bundles_post_ra>
// kernel: tpu_custom_call.1
= control target key start
LH: loop header
LB: loop body
LE: loop exit
PB: predicated region body
PF: predicated region fallthrough
CT: control target
= control target key end

     0   :  { %9 = vsyncpa [#allocation5], 0  ;;  %s352_s0 = inlined_call_operand.hbm [shape: f32[9], index: 0, kind: input, shape index: {}]   ;;  %s353_s1 = inlined_call_operand.vmem [shape: f32[3], index: 1, kind: input, shape index: {}]   ;;  %s354_s2 = inlined_call_operand.vmem [shape: f32[2], index: 2, kind: input, shape index: {}]   ;;  %s355_s3 = inlined_call_operand.hbm [shape: f32[3,8,128], index: 3, kind: input, shape index: {}]   ;;  %s356_s4 = inlined_call_operand.hbm [shape: f32[8,128], index: 4, kind: output, shape index: {}]  }
   0x1   :  { %10 = vsyncpa [#allocation6], 0 }
   0x2   :  { %11 = vsyncpa [#allocation9], 0 }
   0x3   :  { %12 = vsyncpa [#allocation3], 0 }
   0x4   :  { %13 = vsyncpa [#allocation4], 0  ;;  %s28_s17 = sshll.u32 %s353_s1, 4  ;;  %s187_s20 = scalar_lea.hbm %s352_s0, 16  ;;  %s29_s17 = int_to_ptr.vmem [resolvable:$true] %s28_s17 }
   0x5   :  { %p188_p0 = scmp.ne.s32.totalorder %s352_s0, %s187_s20  ;;  %p191_p1 = scmp.lt.u32.totalorder %s187_s20, %s352_s0 }
   0x7   :  { %p193_p2 = pnand %p191_p1, %p188_p0 }
   0x9   :  { %196 = shalt.err (!%p193_p2)
}
   0xa   :  { %s275_s25 = smov [#allocation2]   ;;  %s197_s1 = scalar_lea.vmem %s29_s17, 16 }
   0xb   :  { %21 = dma.hbm_to_smem %s352_s0, 16, %s275_s25, [#allocation5]  }
   0xc   :  { %p198_p3 = scmp.ne.s32.totalorder %s29_s17, %s197_s1  ;;  %p202_p4 = scmp.lt.s32.totalorder %s29_s17, %s29_s17 }
   0xd   :  { %p203_p5 = scmp.lt.s32.totalorder %s197_s1, %s197_s1 }
   0xf   :  { %p204_p6 = por %p203_p5, %p202_p4 }
  0x11   :  { %p205_p7 = pnand %p204_p6, %p198_p3 }
  0x13   :  { %208 = shalt.err (!%p205_p7)
}
  0x14   :  { %s276_s28 = smov [#allocation7]   ;;  %s38_s5 = sshll.u32 %s354_s2, 4  ;;  %s39_s5 = int_to_ptr.vmem [resolvable:$true] %s38_s5 }
  0x15   :  { %31 = dma.vmem_to_smem %s29_s17, 16, %s276_s28, [#allocation6]  }
  0x16   :  { %s209_s6 = scalar_lea.vmem %s39_s5, 16  ;;  %p214_p9 = scmp.lt.s32.totalorder %s39_s5, %s39_s5 }
  0x17   :  { %p210_p8 = scmp.ne.s32.totalorder %s39_s5, %s209_s6  ;;  %p215_p10 = scmp.lt.s32.totalorder %s209_s6, %s209_s6 }
  0x19   :  { %p216_p11 = por %p215_p10, %p214_p9 }
  0x1b   :  { %p217_p12 = pnand %p216_p11, %p210_p8 }
  0x1d   :  { %220 = shalt.err (!%p217_p12)
}
  0x1e   :  { %s277_s0 = smov [#allocation8]   ;;  %s278_s7 = smov [#allocation10]  }
  0x1f   :  { %41 = dma.vmem_to_smem %s39_s5, 16, %s277_s0, [#allocation9]  }
  0x20   :  { %s47_s8 = sshll.u32 %s278_s7, 4  ;;  %s221_s11 = scalar_lea.hbm %s355_s3, 384  ;;  %s48_s8 = int_to_ptr.vmem [resolvable:$true] %s47_s8 }
  0x21   :  { %p222_p13 = scmp.ne.s32.totalorder %s355_s3, %s221_s11  ;;  %p225_p0 = scmp.lt.u32.totalorder %s221_s11, %s355_s3 }
  0x23   :  { %p227_p1 = pnand %p225_p0, %p222_p13 }
  0x25   :  { %230 = shalt.err (!%p227_p1)
}
  0x26   :  { %s231_s15 = scalar_lea.vmem %s48_s8, 384  ;;  %p236_p3 = scmp.lt.s32.totalorder %s48_s8, %s48_s8 }
  0x27   :  { %p232_p2 = scmp.ne.s32.totalorder %s48_s8, %s231_s15  ;;  %p237_p4 = scmp.lt.s32.totalorder %s231_s15, %s231_s15 }
  0x29   :  { %p238_p5 = por %p237_p4, %p236_p3 }
  0x2b   :  { %p239_p6 = pnand %p238_p5, %p232_p2 }
  0x2d   :  { %242 = shalt.err (!%p239_p6)
}
  0x2e   :  { %s279_s16 = smov 128   ;;  %s280_s17 = smov 8  }
  0x2f   :  { %53 = dma.hbm_to_vmem [thread:$0]  %s355_s3, 384, %s48_s8, [#allocation3], %s279_s16, %s279_s16, %s280_s17  }
  0x30   :  { %265 = dma.done.wait [#allocation5], 16  }
  0x31   :  { %266 = vsyncadd [#allocation5], 4294967280 }
  0x32   :  { %267 = dma.done.wait [#allocation6], 16  }
  0x33   :  { %268 = vsyncadd [#allocation6], 4294967280 }
  0x34   :  { %269 = dma.done.wait [#allocation9], 16  }
  0x35   :  { %270 = vsyncadd [#allocation9], 4294967280 }
  0x36   :  { %271 = dma.done.wait [#allocation3], 384  }
  0x37   :  { %272 = vsyncadd [#allocation3], 4294966912 }
  0x38   :  { %66 = sfence }
  0x39   :  { %s67_s20 = sld [smem:[#allocation2]]  ;;  %s165_s21 = sld [smem:[#allocation2 + $0x1]]  ;;  %v81_v0 = vld [vmem:[#allocation10] sm:$0xff]  ;;  %v83_v1 = vld [vmem:[#allocation10 + $0x8] sm:$0xff]  ;;  %v85_v3 = vld [vmem:[#allocation10 + $0x10] sm:$0xff] }
  0x3a   :  { %s166_s22 = sld [smem:[#allocation2 + $0x2]]  ;;  %s167_s23 = sld [smem:[#allocation2 + $0x3]] }
  0x3b   :  { %s168_s24 = sld [smem:[#allocation2 + $0x4]]  ;;  %s169_s25 = sld [smem:[#allocation2 + $0x5]] }
  0x3c   :  { %s170_s26 = sld [smem:[#allocation2 + $0x6]]  ;;  %s337_s27 = sld [smem:[#allocation2 + $0x7]] }
  0x3d   :  { %s172_s1 = sld [smem:[#allocation2 + $0x8]]  ;;  %s174_s28 = sld [smem:[#allocation7 + $0x2]] }
  0x3e   :  { %s76_s3 = sld [smem:[#allocation7]]  ;;  %s173_s29 = sld [smem:[#allocation7 + $0x1]] }
  0x3f   :  { %v86_v2 = vstv %s67_s20  ;;  %v96_v6 = vstv %s165_s21  ;;  %s175_s30 = sld [smem:[#allocation8 + $0x1]]  ;;  %s79_s5 = sld [smem:[#allocation8]] }
  0x40   :  { %v87_v4 = vmul.f32 %v86_v2, %v81_v0  ;;  %v88_v5 = vstv %s167_s23  ;;  %v106_v7 = vstv %s166_s22  ;;  %v97_v16 = vmul.f32 %v96_v6, %v81_v0  ;;  %s281_s6 = smov [#allocation11]  }
  0x41   :  { %v89_v8 = vmul.f32 %v88_v5, %v83_v1  ;;  %v98_v9 = vstv %s168_s24  ;;  %v107_v10 = vmul.f32 %v106_v7, %v81_v0  ;;  %v108_v11 = vstv %s169_s25  ;;  %s153_s0 = sshll.u32 %s281_s6, 4  ;;  %s154_s0 = int_to_ptr.vmem [resolvable:$true] %s153_s0 }
  0x42   :  { %v91_v12 = vstv %s170_s26  ;;  %v109_v13 = vmul.f32 %v108_v11, %v83_v1  ;;  %v99_v18 = vmul.f32 %v98_v9, %v83_v1  ;;  %v101_v22 = vstv %s337_s27  ;;  %s243_s7 = scalar_lea.vmem %s154_s0, 128  ;;  %p248_p8 = scmp.lt.s32.totalorder %s154_s0, %s154_s0 }
  0x43   :  { %v90_v14 = vadd.f32 %v89_v8, %v87_v4  ;;  %v92_v15 = vmul.f32 %v91_v12, %v85_v3  ;;  %v111_v20 = vstv %s172_s1  ;;  %v114_v24 = vstv %s174_s28  ;;  %p244_p7 = scmp.ne.s32.totalorder %s154_s0, %s243_s7  ;;  %p249_p9 = scmp.lt.s32.totalorder %s243_s7, %s243_s7 }
  0x44   :  { %v94_v17 = vstv %s76_s3  ;;  %v110_v19 = vadd.f32 %v109_v13, %v107_v10  ;;  %v112_v23 = vmul.f32 %v111_v20, %v85_v3  ;;  %v100_v27 = vadd.f32 %v99_v18, %v97_v16 }
  0x45   :  { %v93_v21 = vadd.f32 %v92_v15, %v90_v14  ;;  %v102_v28 = vmul.f32 %v101_v22, %v85_v3  ;;  %v104_v33 = vstv %s173_s29  ;;  %v129_v37 = vstv %s175_s30  ;;  %p250_p10 = por %p249_p9, %p248_p8 }
  0x46   :  { %v113_v26 = vadd.f32 %v112_v23, %v110_v19  ;;  %v126_v42 = vstv %s79_s5 }
  0x47   :  { %v95_v25 = vadd.f32 %v94_v17, %v93_v21  ;;  %v103_v32 = vadd.f32 %v102_v28, %v100_v27  ;;  %p251_p11 = pnand %p250_p10, %p244_p7 }
  0x48   :  { %v115_v29 = vadd.f32 %v114_v24, %v113_v26 }
  0x49   :  { %v116_v30 = vmul.f32 %v95_v25, %v95_v25  ;;  %v105_v35 = vadd.f32 %v104_v33, %v103_v32 }
  0x4a   :  { %v117_v31 = vmul.f32 %v115_v29, %v115_v29 }
  0x4b   :  { %v128_v36 = vand.u32 2147483647, %v105_v35 }
  0x4c   :  { %v118_v34 = vadd.f32 %v117_v31, %v116_v30 }
  0x4d   :  { %v130_v38 = vsub.f32 %v128_v36, %v129_v37 }
  0x4e   :  { %183 = vrsqrt.f32 %v118_v34  ;;  %vm121_vm0 = vcmp.eq.f32.partialorder %v118_v34, inf  ;;  %v124_v40 = vand.u32 2147483648, %v118_v34  ;;  %vm123_vm1 = vcmp.eq.f32.partialorder %v118_v34, 0.0 }
  0x4f   :  { %v135_v44 = vmax.f32 %v130_v38, 0.0 }
  0x51   :  { %v136_v48 = vmul.f32 %v135_v44, %v135_v44 }
  0x58   :  { %v184_v39 = vpop.eup %183 }
  0x59   :  { %v120_v41 = vmul.f32 %v184_v39, %v118_v34 }
  0x5b   :  { %v122_v43 = vsel %vm121_vm0, %v118_v34, %v120_v41 }
  0x5c   :  { %v125_v45 = vsel %vm123_vm1, %v124_v40, %v122_v43 }
  0x5d   :  { %v127_v46 = vsub.f32 %v125_v45, %v126_v42 }
  0x5f   :  { %v133_v47 = vmax.f32 %v127_v46, 0.0  ;;  %v131_v51 = vmax.f32 %v127_v46, %v130_v38 }
  0x61   :  { %v134_v49 = vmul.f32 %v133_v47, %v133_v47  ;;  %v132_v54 = vmin.f32 %v131_v51, 0.0 }
  0x63   :  { %v137_v50 = vadd.f32 %v136_v48, %v134_v49 }
  0x65   :  { %185 = vrsqrt.f32 %v137_v50  ;;  %vm140_vm2 = vcmp.eq.f32.partialorder %v137_v50, inf  ;;  %v143_v53 = vand.u32 2147483648, %v137_v50  ;;  %vm142_vm3 = vcmp.eq.f32.partialorder %v137_v50, 0.0 }
  0x6f   :  { %v186_v52 = vpop.eup %185 }
  0x70   :  { %v139_v55 = vmul.f32 %v186_v52, %v137_v50 }
  0x72   :  { %v141_v56 = vsel %vm140_vm2, %v137_v50, %v139_v55 }
  0x73   :  { %v144_v57 = vsel %vm142_vm3, %v143_v53, %v141_v56 }
  0x74   :  { %v145_v58 = vadd.f32 %v144_v57, %v132_v54 }
  0x76   :  { %146 = vst [vmem:[#allocation11] sm:$0xff] %v145_v58 }
  0x77   :  { %254 = shalt.err (!%p251_p11)
}
  0x78   :  { %s255_s10 = scalar_lea.hbm %s356_s4, 128 }
  0x79   :  { %p256_p12 = scmp.ne.s32.totalorder %s356_s4, %s255_s10  ;;  %p259_p13 = scmp.lt.u32.totalorder %s255_s10, %s356_s4 }
  0x7b   :  { %p261_p0 = pnand %p259_p13, %p256_p12 }
  0x7d   :  { %264 = shalt.err (!%p261_p0)
}
  0x7e   :  { %156 = dma.vmem_to_hbm [thread:$0]  %s154_s0, 128, %s356_s4, [#allocation4]  }
  0x7f   :  { %273 = dma.done.wait [#allocation4], 128  }
  0x80   :  { %274 = vsyncadd [#allocation4], 4294967168 }
  0x81   :  { %160 = vsyncpa [#allocation3], 1 }
  0x82   :  { %161 = vsyncpa [#allocation4], 1 }
  0x83   :  { %162 = vsyncpa [#allocation5], 1 }
  0x84   :  { %163 = vsyncpa [#allocation6], 1 }
  0x85   :  { %164 = vsyncpa [#allocation9], 1 }

</bundles_post_ra>
